<compile_context>
chip_gen: v6e
topology: v6e:2x2x1
jax: 0.10.0
libtpu: 0.0.40
codegen_flags: <defaults>
</compile_context>

<pallas_src>
import functools
import math

import jax
import jax.numpy as jnp
from jax.experimental import pallas as pl
from jax.experimental.pallas import tpu as pltpu

LANE = 128
DEFAULT_TM = 512    # output row tile (adj rows / support rows)
DEFAULT_TK = 1024   # adjacency contraction tile (adj cols / support rows)
DEFAULT_TKF = 512   # feature contraction tile (F_in)


def _round_up(a, b):
    return (a + b - 1) // b * b


def _dim_tile(dim, target):
    """Pad `dim` to a lane multiple and pick a tile that divides it.

    Never shrinks the tile below `target` for large dims: the dim is padded up
    to a multiple of the tile instead (a few zero rows are far cheaper than
    degrading the HBM-bound streams to narrow tiles)."""
    d = _round_up(max(dim, LANE), LANE)
    t = min(target, d)
    return _round_up(d, t), t


def _n_pad_and_tiles(n, tm_target, tk_target):
    """Padded N plus row/contraction tiles such that both divide padded N."""
    d = _round_up(max(n, LANE), LANE)
    tm = min(tm_target, d)
    tk = min(tk_target, d)
    n_p = _round_up(d, math.lcm(tm, tk))
    return n_p, tm, tk


def prepare_adjacency(adj, *, tm=DEFAULT_TM, tk=DEFAULT_TK):
    """Pad + bf16-cast the dense adjacency ONCE, outside the per-call hot path.

    The adjacency is static across layers / training steps, so its pad+cast
    (a full N^2 read + write) must not be repeated every forward call."""
    n = adj.shape[0]
    n_p, _, _ = _n_pad_and_tiles(n, tm, tk)
    adj_p = jnp.zeros((n_p, n_p), jnp.bfloat16).at[:n, :n].set(
        adj.astype(jnp.bfloat16))
    return adj_p


# ----------------------------- kernels -------------------------------------


def _support_kernel(x_ref, w_ref, s_ref, acc_ref):
    """Stage 1: support = x @ W.  Grid (i = row tile, k = F_in tile)."""
    k = pl.program_id(1)

    @pl.when(k == 0)
    def _():
        acc_ref[...] = jnp.zeros_like(acc_ref)

    acc_ref[...] += jnp.dot(x_ref[...], w_ref[...],
                            preferred_element_type=jnp.float32)

    @pl.when(k == pl.num_programs(1) - 1)
    def _():
        s_ref[...] = acc_ref[...].astype(s_ref.dtype)


def _aggregate_kernel(adj_ref, s_ref, b_ref, out_ref, acc_ref):
    """Stage 2: out = adj @ support + bias.  Grid (i = row tile, k = N tile)."""
    k = pl.program_id(1)

    @pl.when(k == 0)
    def _():
        acc_ref[...] = jnp.zeros_like(acc_ref)

    acc_ref[...] += jnp.dot(adj_ref[...], s_ref[...],
                            preferred_element_type=jnp.float32)

    @pl.when(k == pl.num_programs(1) - 1)
    def _():
        out_ref[...] = acc_ref[...] + b_ref[...]


# ----------------------------- forward -------------------------------------


@functools.partial(jax.jit, static_argnames=("tm", "tk", "tkf"))
def gcn_forward(x, adj_p, weight, bias, *,
                tm=DEFAULT_TM, tk=DEFAULT_TK, tkf=DEFAULT_TKF):
    """x: (N, F_in) f32, adj_p: pre-padded bf16 (N_p, N_p) from
    prepare_adjacency, weight: (F_in, F_out) f32, bias: (F_out,) f32."""
    n, f_in = x.shape
    f_out = weight.shape[1]
    n_p = adj_p.shape[0]

    tm = min(tm, n_p)
    tk = min(tk, n_p)
    assert n_p % tm == 0 and n_p % tk == 0, (
        "adj_p padding inconsistent with tile sizes; use prepare_adjacency "
        "with the same tm/tk")

    f_in_p, tkf = _dim_tile(f_in, tkf)
    f_out_p = _round_up(max(f_out, LANE), LANE)

    # Per-call pads (cheap vs. adj; x changes every layer so it stays in-jit).
    # Zero padding is exact: padded adj columns hit zero support rows, padded
    # feature columns of W/bias are zero, padded output rows/cols are sliced.
    x_p = jnp.zeros((n_p, f_in_p), jnp.bfloat16).at[:n, :f_in].set(
        x.astype(jnp.bfloat16))
    w_p = jnp.zeros((f_in_p, f_out_p), jnp.bfloat16).at[:f_in, :f_out].set(
        weight.astype(jnp.bfloat16))
    b_p = jnp.zeros((1, f_out_p), jnp.float32).at[0, :f_out].set(
        bias.astype(jnp.float32))

    # --- Stage 1: support = x @ W, computed once (not once per row tile). ---
    support_cost = pl.CostEstimate(
        flops=2 * n_p * f_in_p * f_out_p,
        transcendentals=0,
        bytes_accessed=2 * (n_p * f_in_p + f_in_p * f_out_p + n_p * f_out_p),
    )
    support = pl.pallas_call(
        _support_kernel,
        out_shape=jax.ShapeDtypeStruct((n_p, f_out_p), jnp.bfloat16),
        grid_spec=pltpu.PrefetchScalarGridSpec(
            num_scalar_prefetch=0,
            grid=(n_p // tm, f_in_p // tkf),
            in_specs=[
                pl.BlockSpec((tm, tkf), lambda i, k: (i, k)),        # x
                pl.BlockSpec((tkf, f_out_p), lambda i, k: (k, 0)),   # weight
            ],
            out_specs=pl.BlockSpec((tm, f_out_p), lambda i, k: (i, 0)),
            scratch_shapes=[pltpu.VMEM((tm, f_out_p), jnp.float32)],
        ),
        compiler_params=pltpu.CompilerParams(
            dimension_semantics=("parallel", "arbitrary")),
        cost_estimate=support_cost,
    )(x_p, w_p)

    # --- Stage 2: out = adj @ support + bias (HBM-bound on the adj stream). --
    grid_k = n_p // tk
    if grid_k >= 3:
        # Deeper buffering keeps the bandwidth-bound adj DMA hidden behind the
        # short (half-width-MXU) compute per step.
        adj_spec = pl.BlockSpec((tm, tk), lambda i, k: (i, k),
                                pipeline_mode=pl.Buffered(3))
    else:
        adj_spec = pl.BlockSpec((tm, tk), lambda i, k: (i, k))

    agg_cost = pl.CostEstimate(
        flops=2 * n_p * n_p * f_out_p,
        transcendentals=0,
        bytes_accessed=(2 * (n_p * n_p + n_p * f_out_p)        # adj + support (bf16)
                        + 4 * (n_p * f_out_p + f_out_p)),       # out + bias (f32)
    )
    out_p = pl.pallas_call(
        _aggregate_kernel,
        out_shape=jax.ShapeDtypeStruct((n_p, f_out_p), jnp.float32),
        grid_spec=pltpu.PrefetchScalarGridSpec(
            num_scalar_prefetch=0,
            grid=(n_p // tm, grid_k),
            in_specs=[
                adj_spec,                                              # adj
                pl.BlockSpec((tk, f_out_p), lambda i, k: (k, 0)),      # support
                pl.BlockSpec((1, f_out_p), lambda i, k: (0, 0)),       # bias
            ],
            out_specs=pl.BlockSpec((tm, f_out_p), lambda i, k: (i, 0)),
            scratch_shapes=[pltpu.VMEM((tm, f_out_p), jnp.float32)],
        ),
        compiler_params=pltpu.CompilerParams(
            dimension_semantics=("parallel", "arbitrary")),
        cost_estimate=agg_cost,
    )(adj_p, support, b_p)

    return out_p[:n, :f_out]


def graph_convolution(x, adj, weight, bias=None, *,
                      tm=DEFAULT_TM, tk=DEFAULT_TK, tkf=DEFAULT_TKF):
    """Drop-in equivalent of GraphConvolution.forward(input, adj).

    Pads/casts adj per call; in a training/inference loop prefer calling
    prepare_adjacency() once and gcn_forward() per layer/step."""
    if bias is None:
        bias = jnp.zeros((weight.shape[1],), jnp.float32)
    adj_p = prepare_adjacency(adj, tm=tm, tk=tk)
    return gcn_forward(x, adj_p, weight, bias, tm=tm, tk=tk, tkf=tkf)


if __name__ == "__main__":
    # Small shapes consistent with the module: N nodes, in/out feature dims.
    N, F_IN, F_OUT = 64, 32, 16

    key = jax.random.PRNGKey(0)
    k_x, k_adj, k_w, k_b = jax.random.split(key, 4)

    # Deterministic parameter init mirroring reset_parameters():
    # uniform(-stdv, stdv) with stdv = 1/sqrt(out_features).
    stdv = 1.0 / math.sqrt(F_OUT)
    weight = jax.random.uniform(k_w, (F_IN, F_OUT), jnp.float32, -stdv, stdv)
    bias = jax.random.uniform(k_b, (F_OUT,), jnp.float32, -stdv, stdv)

    # Example inputs: node features and a row-normalized dense adjacency.
    x = jax.random.normal(k_x, (N, F_IN), jnp.float32)
    adj_raw = (jax.random.uniform(k_adj, (N, N)) < 0.2).astype(jnp.float32)
    adj_raw = adj_raw + jnp.eye(N, dtype=jnp.float32)  # self-loops
    adj = adj_raw / jnp.sum(adj_raw, axis=1, keepdims=True)

    # Recommended usage: pad/cast the (static) adjacency once, reuse per call.
    adj_p = prepare_adjacency(adj)
    out = gcn_forward(x, adj_p, weight, bias)
    out = jax.block_until_ready(out)
    assert out.shape == (N, F_OUT)

    # Reference 1: emulate the kernel's bf16-input / f32-accumulate arithmetic.
    x_bf, w_bf, adj_bf = (a.astype(jnp.bfloat16) for a in (x, weight, adj))
    support_bf = jnp.dot(x_bf, w_bf, preferred_element_type=jnp.float32)
    ref_bf16 = jnp.dot(adj_bf, support_bf.astype(jnp.bfloat16),
                       preferred_element_type=jnp.float32) + bias
    assert jnp.allclose(out, ref_bf16, atol=2e-3, rtol=2e-3)

    # Reference 2: full-precision forward (loose tolerance for bf16 compute).
    ref_f32 = adj @ (x @ weight) + bias
    assert jnp.allclose(out, ref_f32, atol=5e-2, rtol=5e-2)

    # Also exercise the drop-in convenience wrapper (and bias=None path).
    out2 = jax.block_until_ready(graph_convolution(x, adj, weight, bias))
    assert jnp.allclose(out, out2)
    out_nb = jax.block_until_ready(graph_convolution(x, adj, weight, None))
    assert jnp.allclose(out_nb, out - bias, atol=2e-3, rtol=2e-3)

    print("KERNEL_OK")
</pallas_src>

<mosaic_0001>
module attributes {stable_mosaic.version = 11 : i64} {
  func.func @_support_kernel(%arg0: i32, %arg1: i32, %arg2: memref<128x128xbf16, #tpu.memory_space<vmem>>, %arg3: memref<128x128xbf16, #tpu.memory_space<vmem>>, %arg4: memref<128x128xbf16, #tpu.memory_space<vmem>>, %arg5: memref<128x128xf32, #tpu.memory_space<vmem>>) attributes {dimension_semantics = [#tpu.dimension_semantics<parallel>, #tpu.dimension_semantics<arbitrary>], iteration_bounds = array<i64: 1, 1>, scalar_prefetch = 0 : i64, scratch_operands = 1 : i64, tpu.core_type = #tpu.core_type<tc>, window_params = [{transform_indices = @transform_0, window_bounds = array<i64: 128, 128>}, {transform_indices = @transform_1, window_bounds = array<i64: 128, 128>}, {transform_indices = @transform_2, window_bounds = array<i64: 128, 128>}]} {
    %c0_i32 = arith.constant 0 : i32
    %0 = arith.cmpi eq, %arg1, %c0_i32 : i32
    %1 = arith.extui %0 : i1 to i32
    %c0_i32_0 = arith.constant 0 : i32
    %2 = arith.cmpi ne, %1, %c0_i32_0 : i32
    scf.if %2 {
      %cst_10 = arith.constant 0.000000e+00 : f32
      %12 = vector.broadcast %cst_10 : f32 to vector<128x128xf32>
      %c0_11 = arith.constant 0 : index
      %c0_12 = arith.constant 0 : index
      %13 = vector.load %arg5[%c0_11, %c0_12] : memref<128x128xf32, #tpu.memory_space<vmem>>, vector<128x128xf32>
      tpu.vector_store %arg5[%c0_11, %c0_12], %12 {strides = array<i32>} : memref<128x128xf32, #tpu.memory_space<vmem>>, vector<128x128xf32>,
    } else {
    }
    %c0 = arith.constant 0 : index
    %c0_1 = arith.constant 0 : index
    %3 = vector.load %arg5[%c0, %c0_1] : memref<128x128xf32, #tpu.memory_space<vmem>>, vector<128x128xf32>
    %c0_2 = arith.constant 0 : index
    %c0_3 = arith.constant 0 : index
    %4 = vector.load %arg2[%c0_2, %c0_3] : memref<128x128xbf16, #tpu.memory_space<vmem>>, vector<128x128xbf16>
    %c0_4 = arith.constant 0 : index
    %c0_5 = arith.constant 0 : index
    %5 = vector.load %arg3[%c0_4, %c0_5] : memref<128x128xbf16, #tpu.memory_space<vmem>>, vector<128x128xbf16>
    %cst = arith.constant dense<0.000000e+00> : vector<128x128xf32>
    %6 = tpu.matmul %4, %5, %cst {dimension_numbers = #tpu.dot_dimension_numbers<[1], [0], [0], [1], [0, 0, 1, 1], [], []>} : vector<128x128xbf16>, vector<128x128xbf16>, vector<128x128xf32> -> vector<128x128xf32>
    %7 = arith.addf %3, %6 : vector<128x128xf32>
    %c0_6 = arith.constant 0 : index
    %c0_7 = arith.constant 0 : index
    %8 = vector.load %arg5[%c0_6, %c0_7] : memref<128x128xf32, #tpu.memory_space<vmem>>, vector<128x128xf32>
    tpu.vector_store %arg5[%c0_6, %c0_7], %7 {strides = array<i32>} : memref<128x128xf32, #tpu.memory_space<vmem>>, vector<128x128xf32>,
    %c0_i32_8 = arith.constant 0 : i32
    %9 = arith.cmpi eq, %arg1, %c0_i32_8 : i32
    %10 = arith.extui %9 : i1 to i32
    %c0_i32_9 = arith.constant 0 : i32
    %11 = arith.cmpi ne, %10, %c0_i32_9 : i32
    scf.if %11 {
      %c0_10 = arith.constant 0 : index
      %c0_11 = arith.constant 0 : index
      %12 = vector.load %arg5[%c0_10, %c0_11] : memref<128x128xf32, #tpu.memory_space<vmem>>, vector<128x128xf32>
      %13 = arith.truncf %12 : vector<128x128xf32> to vector<128x128xbf16>
      %c0_12 = arith.constant 0 : index
      %c0_13 = arith.constant 0 : index
      %14 = vector.load %arg4[%c0_12, %c0_13] : memref<128x128xbf16, #tpu.memory_space<vmem>>, vector<128x128xbf16>
      tpu.vector_store %arg4[%c0_12, %c0_13], %13 {strides = array<i32>} : memref<128x128xbf16, #tpu.memory_space<vmem>>, vector<128x128xbf16>,
    } else {
    }
    return
  }
  func.func @transform_0(%arg0: i32, %arg1: i32) -> (i32, i32) {
    %c0_i32 = arith.constant 0 : i32
    return %arg0, %arg1 : i32, i32
  }
  func.func @transform_1(%arg0: i32, %arg1: i32) -> (i32, i32) {
    %c0_i32 = arith.constant 0 : i32
    %c0_i32_0 = arith.constant 0 : i32
    return %arg1, %c0_i32 : i32, i32
  }
  func.func @transform_2(%arg0: i32, %arg1: i32) -> (i32, i32) {
    %c0_i32 = arith.constant 0 : i32
    %c0_i32_0 = arith.constant 0 : i32
    return %arg0, %c0_i32 : i32, i32
  }
}

module attributes {stable_mosaic.version = 11 : i64} {
  func.func @_aggregate_kernel(%arg0: i32, %arg1: i32, %arg2: memref<128x128xbf16, #tpu.memory_space<vmem>>, %arg3: memref<128x128xbf16, #tpu.memory_space<vmem>>, %arg4: memref<1x128xf32, #tpu.memory_space<vmem>>, %arg5: memref<128x128xf32, #tpu.memory_space<vmem>>, %arg6: memref<128x128xf32, #tpu.memory_space<vmem>>) attributes {dimension_semantics = [#tpu.dimension_semantics<parallel>, #tpu.dimension_semantics<arbitrary>], iteration_bounds = array<i64: 1, 1>, scalar_prefetch = 0 : i64, scratch_operands = 1 : i64, tpu.core_type = #tpu.core_type<tc>, window_params = [{transform_indices = @transform_0, window_bounds = array<i64: 128, 128>}, {transform_indices = @transform_1, window_bounds = array<i64: 128, 128>}, {pipeline_mode = #tpu.pipeline_mode<synchronous>, transform_indices = @transform_2, window_bounds = array<i64: 1, 128>}, {transform_indices = @transform_3, window_bounds = array<i64: 128, 128>}]} {
    %c0_i32 = arith.constant 0 : i32
    %0 = arith.cmpi eq, %arg1, %c0_i32 : i32
    %1 = arith.extui %0 : i1 to i32
    %c0_i32_0 = arith.constant 0 : i32
    %2 = arith.cmpi ne, %1, %c0_i32_0 : i32
    scf.if %2 {
      %cst_10 = arith.constant 0.000000e+00 : f32
      %12 = vector.broadcast %cst_10 : f32 to vector<128x128xf32>
      %c0_11 = arith.constant 0 : index
      %c0_12 = arith.constant 0 : index
      %13 = vector.load %arg6[%c0_11, %c0_12] : memref<128x128xf32, #tpu.memory_space<vmem>>, vector<128x128xf32>
      tpu.vector_store %arg6[%c0_11, %c0_12], %12 {strides = array<i32>} : memref<128x128xf32, #tpu.memory_space<vmem>>, vector<128x128xf32>,
    } else {
    }
    %c0 = arith.constant 0 : index
    %c0_1 = arith.constant 0 : index
    %3 = vector.load %arg6[%c0, %c0_1] : memref<128x128xf32, #tpu.memory_space<vmem>>, vector<128x128xf32>
    %c0_2 = arith.constant 0 : index
    %c0_3 = arith.constant 0 : index
    %4 = vector.load %arg2[%c0_2, %c0_3] : memref<128x128xbf16, #tpu.memory_space<vmem>>, vector<128x128xbf16>
    %c0_4 = arith.constant 0 : index
    %c0_5 = arith.constant 0 : index
    %5 = vector.load %arg3[%c0_4, %c0_5] : memref<128x128xbf16, #tpu.memory_space<vmem>>, vector<128x128xbf16>
    %cst = arith.constant dense<0.000000e+00> : vector<128x128xf32>
    %6 = tpu.matmul %4, %5, %cst {dimension_numbers = #tpu.dot_dimension_numbers<[1], [0], [0], [1], [0, 0, 1, 1], [], []>} : vector<128x128xbf16>, vector<128x128xbf16>, vector<128x128xf32> -> vector<128x128xf32>
    %7 = arith.addf %3, %6 : vector<128x128xf32>
    %c0_6 = arith.constant 0 : index
    %c0_7 = arith.constant 0 : index
    %8 = vector.load %arg6[%c0_6, %c0_7] : memref<128x128xf32, #tpu.memory_space<vmem>>, vector<128x128xf32>
    tpu.vector_store %arg6[%c0_6, %c0_7], %7 {strides = array<i32>} : memref<128x128xf32, #tpu.memory_space<vmem>>, vector<128x128xf32>,
    %c0_i32_8 = arith.constant 0 : i32
    %9 = arith.cmpi eq, %arg1, %c0_i32_8 : i32
    %10 = arith.extui %9 : i1 to i32
    %c0_i32_9 = arith.constant 0 : i32
    %11 = arith.cmpi ne, %10, %c0_i32_9 : i32
    scf.if %11 {
      %c0_10 = arith.constant 0 : index
      %c0_11 = arith.constant 0 : index
      %12 = vector.load %arg6[%c0_10, %c0_11] : memref<128x128xf32, #tpu.memory_space<vmem>>, vector<128x128xf32>
      %c0_12 = arith.constant 0 : index
      %c0_13 = arith.constant 0 : index
      %13 = vector.load %arg4[%c0_12, %c0_13] : memref<1x128xf32, #tpu.memory_space<vmem>>, vector<1x128xf32>
      %14 = vector.broadcast %13 : vector<1x128xf32> to vector<128x128xf32>
      %15 = arith.addf %12, %14 : vector<128x128xf32>
      %c0_14 = arith.constant 0 : index
      %c0_15 = arith.constant 0 : index
      %16 = vector.load %arg5[%c0_14, %c0_15] : memref<128x128xf32, #tpu.memory_space<vmem>>, vector<128x128xf32>
      tpu.vector_store %arg5[%c0_14, %c0_15], %15 {strides = array<i32>} : memref<128x128xf32, #tpu.memory_space<vmem>>, vector<128x128xf32>,
    } else {
    }
    return
  }
  func.func @transform_0(%arg0: i32, %arg1: i32) -> (i32, i32) {
    %c0_i32 = arith.constant 0 : i32
    return %arg0, %arg1 : i32, i32
  }
  func.func @transform_1(%arg0: i32, %arg1: i32) -> (i32, i32) {
    %c0_i32 = arith.constant 0 : i32
    %c0_i32_0 = arith.constant 0 : i32
    return %arg1, %c0_i32 : i32, i32
  }
  func.func @transform_2(%arg0: i32, %arg1: i32) -> (i32, i32) {
    %c0_i32 = arith.constant 0 : i32
    %c0_i32_0 = arith.constant 0 : i32
    %c0_i32_1 = arith.constant 0 : i32
    return %c0_i32, %c0_i32_0 : i32, i32
  }
  func.func @transform_3(%arg0: i32, %arg1: i32) -> (i32, i32) {
    %c0_i32 = arith.constant 0 : i32
    %c0_i32_0 = arith.constant 0 : i32
    return %arg0, %c0_i32 : i32, i32
  }
}

</mosaic_0001>

<bundles_post_ra>
// kernel: gcn_forward.2
= control target key start
LH: loop header
LB: loop body
LE: loop exit
PB: predicated region body
PF: predicated region fallthrough
CT: control target
= control target key end

     0   :  { %s670_s1 = inlined_call_operand.vmem [shape: bf16[128,128], index: 1, kind: input, shape index: {}]   ;;  %s671_s0 = inlined_call_operand.vmem [shape: bf16[128,128], index: 0, kind: input, shape index: {}]   ;;  %s672_s2 = inlined_call_operand.vmem [shape: bf16[128,128], index: 2, kind: output, shape index: {}]  }
   0x1   :  { %v567_v0 = vld [vmem:[%s670_s1 + $0x38] sm:$0xff]   ;;  %v568_v1 = vld [vmem:[%s670_s1 + $0x30] sm:$0xff]   ;;  %v569_v2 = vld [vmem:[%s670_s1 + $0x28] sm:$0xff]  }
   0x2   :  { %519 = vmatprep.subr.bf16.mxu0 %v567_v0  ;;  %551 = vmatprep.subr.bf16.mxu1 %v567_v0  ;;  %v570_v3 = vld [vmem:[%s670_s1 + $0x20] sm:$0xff]   ;;  %v571_v6 = vld [vmem:[%s670_s1 + $0x18] sm:$0xff]   ;;  %v572_v7 = vld [vmem:[%s670_s1 + $0x10] sm:$0xff]  }
   0x3   :  { %520 = vmatpush3.bf16.msra.mxu0 %v567_v0  ;;  %559 = vmatpush3.bf16.msra.mxu1 %v567_v0  ;;  %v575_v4 = vld [vmem:[%s671_s0] sm:$0xff]   ;;  %v573_v8 = vld [vmem:[%s670_s1 + $0x8] sm:$0xff]   ;;  %v579_v12 = vld [vmem:[%s671_s0 + $0x10] sm:$0xff]  }
   0x4   :  { %521 = vmatprep.subr.bf16.mxu0 %v568_v1  ;;  %552 = vmatprep.subr.bf16.mxu1 %v568_v1  ;;  %v576_v5 = vld [vmem:[%s671_s0 + $0x20] sm:$0xff]   ;;  %v577_v10 = vld [vmem:[%s671_s0 + $0x8] sm:$0xff]   ;;  %v580_v13 = vld [vmem:[%s671_s0 + $0x30] sm:$0xff]  }
   0x5   :  { %535 = vmatprep.mubr.bf16.mxu0 %v575_v4  ;;  %543 = vmatprep.mubr.bf16.mxu1 %v576_v5  ;;  %v574_v9 = vld [vmem:[%s670_s1] sm:$0xff]   ;;  %v578_v11 = vld [vmem:[%s671_s0 + $0x28] sm:$0xff]   ;;  %v581_v14 = vld [vmem:[%s671_s0 + $0x18] sm:$0xff]  }
   0x6   :  { %v582_v15 = vld [vmem:[%s671_s0 + $0x38] sm:$0xff]  }
   0x7   :  { %522 = vmatpush3.bf16.msra.mxu0 %v568_v1  ;;  %560 = vmatpush3.bf16.msra.mxu1 %v568_v1 }
   0x8   :  { %523 = vmatprep.subr.bf16.mxu0 %v569_v2  ;;  %553 = vmatprep.subr.bf16.mxu1 %v569_v2 }
   0xb   :  { %524 = vmatpush3.bf16.msra.mxu0 %v569_v2  ;;  %561 = vmatpush3.bf16.msra.mxu1 %v569_v2 }
   0xc   :  { %525 = vmatprep.subr.bf16.mxu0 %v570_v3  ;;  %554 = vmatprep.subr.bf16.mxu1 %v570_v3 }
   0xf   :  { %526 = vmatpush3.bf16.msra.mxu0 %v570_v3  ;;  %562 = vmatpush3.bf16.msra.mxu1 %v570_v3 }
  0x10   :  { %527 = vmatprep.subr.bf16.mxu0 %v571_v6  ;;  %555 = vmatprep.subr.bf16.mxu1 %v571_v6 }
  0x13   :  { %528 = vmatpush3.bf16.msra.mxu0 %v571_v6  ;;  %563 = vmatpush3.bf16.msra.mxu1 %v571_v6 }
  0x14   :  { %529 = vmatprep.subr.bf16.mxu0 %v572_v7  ;;  %556 = vmatprep.subr.bf16.mxu1 %v572_v7 }
  0x17   :  { %530 = vmatpush3.bf16.msra.mxu0 %v572_v7  ;;  %564 = vmatpush3.bf16.msra.mxu1 %v572_v7 }
  0x18   :  { %531 = vmatprep.subr.bf16.mxu0 %v573_v8  ;;  %557 = vmatprep.subr.bf16.mxu1 %v573_v8 }
  0x1b   :  { %532 = vmatpush3.bf16.msra.mxu0 %v573_v8  ;;  %565 = vmatpush3.bf16.msra.mxu1 %v573_v8 }
  0x1c   :  { %533 = vmatprep.subr.bf16.mxu0 %v574_v9  ;;  %558 = vmatprep.subr.bf16.mxu1 %v574_v9 }
  0x1f   :  { %534 = vmatpush3.bf16.msra.mxu0 %v574_v9  ;;  %566 = vmatpush3.bf16.msra.mxu1 %v574_v9 }
  0x22   :  { %536 = vmatmul.mubr.bf16.vlgmr.msra.gmra.mxu0 %v577_v10  ;;  %544 = vmatmul.mubr.bf16.vlgmr.msra.gmra.mxu1 %v578_v11 }
  0x23   :  { %539 = vmatprep.mubr.bf16.mxu0 %v579_v12  ;;  %547 = vmatprep.mubr.bf16.mxu1 %v580_v13 }
  0x2a   :  { %540 = vmatmul.mubr.bf16.gmra.mxu0 %v581_v14  ;;  %548 = vmatmul.mubr.bf16.gmra.mxu1 %v582_v15 }
  0xe2   :  { %v537_v16 = vpop.f32.mrf.mxu0  ;;  %v545_v17 = vpop.f32.mrf.mxu1 }
  0xe4   :  { %v210_v18 = vpop.f32.mrf.mxu0  ;;  %v242_v19 = vpop.f32.mrf.mxu1 }
  0xe6   :  { %v538_v20 = vpop.f32.mrf.mxu0  ;;  %v546_v21 = vpop.f32.mrf.mxu1 }
  0xe7   :  { %v464_v22 = vpack.c.bf16 %v538_v20, %v537_v16  ;;  %v484_v23 = vpack.c.bf16 %v546_v21, %v545_v17 }
  0xe8   :  { %v213_v24 = vpop.f32.mrf.mxu0  ;;  %v245_v25 = vpop.f32.mrf.mxu1 }
  0xe9   :  { %496 = vst [vmem:[%s672_s2 + $0x8] sm:$0xff] %v464_v22   ;;  %500 = vst [vmem:[%s672_s2 + $0x28] sm:$0xff] %v484_v23   ;;  %v459_v26 = vpack.c.bf16 %v213_v24, %v210_v18  ;;  %v479_v27 = vpack.c.bf16 %v245_v25, %v242_v19 }
  0xea   :  { %v541_v28 = vpop.f32.mrf.mxu0  ;;  %v549_v29 = vpop.f32.mrf.mxu1 }
  0xeb   :  { %460 = vst [vmem:[%s672_s2] sm:$0xff] %v459_v26   ;;  %499 = vst [vmem:[%s672_s2 + $0x20] sm:$0xff] %v479_v27  }
  0xec   :  { %v226_v30 = vpop.f32.mrf.mxu0  ;;  %v258_v31 = vpop.f32.mrf.mxu1 }
  0xee   :  { %v542_v32 = vpop.f32.mrf.mxu0  ;;  %v550_v33 = vpop.f32.mrf.mxu1 }
  0xef   :  { %v474_v34 = vpack.c.bf16 %v542_v32, %v541_v28  ;;  %v494_v35 = vpack.c.bf16 %v550_v33, %v549_v29 }
  0xf0   :  { %v229_v36 = vpop.f32.mrf.mxu0  ;;  %v261_v37 = vpop.f32.mrf.mxu1 }
  0xf1   :  { %498 = vst [vmem:[%s672_s2 + $0x18] sm:$0xff] %v474_v34   ;;  %502 = vst [vmem:[%s672_s2 + $0x38] sm:$0xff] %v494_v35   ;;  %v469_v38 = vpack.c.bf16 %v229_v36, %v226_v30  ;;  %v489_v39 = vpack.c.bf16 %v261_v37, %v258_v31 }
  0xf3   :  { %497 = vst [vmem:[%s672_s2 + $0x10] sm:$0xff] %v469_v38   ;;  %501 = vst [vmem:[%s672_s2 + $0x30] sm:$0xff] %v489_v39  }

// kernel: gcn_forward.3
= control target key start
LH: loop header
LB: loop body
LE: loop exit
PB: predicated region body
PF: predicated region fallthrough
CT: control target
= control target key end

     0   :  { %s586_s1 = inlined_call_operand.vmem [shape: bf16[128,128], index: 1, kind: input, shape index: {}]   ;;  %s587_s0 = inlined_call_operand.vmem [shape: bf16[128,128], index: 0, kind: input, shape index: {}]   ;;  %s588_s2 = inlined_call_operand.vmem [shape: f32[1,128], index: 2, kind: input, shape index: {}]   ;;  %s589_s3 = inlined_call_operand.vmem [shape: f32[128,128], index: 3, kind: output, shape index: {}]  }
   0x1   :  { %v451_v0 = vld [vmem:[%s586_s1 + $0x38] sm:$0xff]   ;;  %v452_v1 = vld [vmem:[%s586_s1 + $0x30] sm:$0xff]   ;;  %v453_v2 = vld [vmem:[%s586_s1 + $0x28] sm:$0xff]  }
   0x2   :  { %403 = vmatprep.subr.bf16.mxu0 %v451_v0  ;;  %435 = vmatprep.subr.bf16.mxu1 %v451_v0  ;;  %v454_v3 = vld [vmem:[%s586_s1 + $0x20] sm:$0xff]   ;;  %v455_v6 = vld [vmem:[%s586_s1 + $0x18] sm:$0xff]   ;;  %v456_v7 = vld [vmem:[%s586_s1 + $0x10] sm:$0xff]  }
   0x3   :  { %404 = vmatpush3.bf16.msra.mxu0 %v451_v0  ;;  %443 = vmatpush3.bf16.msra.mxu1 %v451_v0  ;;  %v459_v4 = vld [vmem:[%s587_s0] sm:$0xff]   ;;  %v457_v8 = vld [vmem:[%s586_s1 + $0x8] sm:$0xff]   ;;  %v463_v12 = vld [vmem:[%s587_s0 + $0x10] sm:$0xff]  }
   0x4   :  { %405 = vmatprep.subr.bf16.mxu0 %v452_v1  ;;  %436 = vmatprep.subr.bf16.mxu1 %v452_v1  ;;  %v460_v5 = vld [vmem:[%s587_s0 + $0x20] sm:$0xff]   ;;  %v461_v10 = vld [vmem:[%s587_s0 + $0x8] sm:$0xff]   ;;  %v464_v13 = vld [vmem:[%s587_s0 + $0x30] sm:$0xff]  }
   0x5   :  { %419 = vmatprep.mubr.bf16.mxu0 %v459_v4  ;;  %427 = vmatprep.mubr.bf16.mxu1 %v460_v5  ;;  %v458_v9 = vld [vmem:[%s586_s1] sm:$0xff]   ;;  %v462_v11 = vld [vmem:[%s587_s0 + $0x28] sm:$0xff]   ;;  %v465_v14 = vld [vmem:[%s587_s0 + $0x18] sm:$0xff]  }
   0x6   :  { %v466_v15 = vld [vmem:[%s587_s0 + $0x38] sm:$0xff]   ;;  %v386_v16 = vld [vmem:[%s588_s2] ss:$0 sm:$0xff] }
   0x7   :  { %406 = vmatpush3.bf16.msra.mxu0 %v452_v1  ;;  %444 = vmatpush3.bf16.msra.mxu1 %v452_v1 }
   0x8   :  { %407 = vmatprep.subr.bf16.mxu0 %v453_v2  ;;  %437 = vmatprep.subr.bf16.mxu1 %v453_v2 }
   0xb   :  { %408 = vmatpush3.bf16.msra.mxu0 %v453_v2  ;;  %445 = vmatpush3.bf16.msra.mxu1 %v453_v2 }
   0xc   :  { %409 = vmatprep.subr.bf16.mxu0 %v454_v3  ;;  %438 = vmatprep.subr.bf16.mxu1 %v454_v3 }
   0xf   :  { %410 = vmatpush3.bf16.msra.mxu0 %v454_v3  ;;  %446 = vmatpush3.bf16.msra.mxu1 %v454_v3 }
  0x10   :  { %411 = vmatprep.subr.bf16.mxu0 %v455_v6  ;;  %439 = vmatprep.subr.bf16.mxu1 %v455_v6 }
  0x13   :  { %412 = vmatpush3.bf16.msra.mxu0 %v455_v6  ;;  %447 = vmatpush3.bf16.msra.mxu1 %v455_v6 }
  0x14   :  { %413 = vmatprep.subr.bf16.mxu0 %v456_v7  ;;  %440 = vmatprep.subr.bf16.mxu1 %v456_v7 }
  0x17   :  { %414 = vmatpush3.bf16.msra.mxu0 %v456_v7  ;;  %448 = vmatpush3.bf16.msra.mxu1 %v456_v7 }
  0x18   :  { %415 = vmatprep.subr.bf16.mxu0 %v457_v8  ;;  %441 = vmatprep.subr.bf16.mxu1 %v457_v8 }
  0x1b   :  { %416 = vmatpush3.bf16.msra.mxu0 %v457_v8  ;;  %449 = vmatpush3.bf16.msra.mxu1 %v457_v8 }
  0x1c   :  { %417 = vmatprep.subr.bf16.mxu0 %v458_v9  ;;  %442 = vmatprep.subr.bf16.mxu1 %v458_v9 }
  0x1f   :  { %418 = vmatpush3.bf16.msra.mxu0 %v458_v9  ;;  %450 = vmatpush3.bf16.msra.mxu1 %v458_v9 }
  0x22   :  { %420 = vmatmul.mubr.bf16.vlgmr.msra.gmra.mxu0 %v461_v10  ;;  %428 = vmatmul.mubr.bf16.vlgmr.msra.gmra.mxu1 %v462_v11 }
  0x23   :  { %423 = vmatprep.mubr.bf16.mxu0 %v463_v12  ;;  %431 = vmatprep.mubr.bf16.mxu1 %v464_v13 }
  0x2a   :  { %424 = vmatmul.mubr.bf16.gmra.mxu0 %v465_v14  ;;  %432 = vmatmul.mubr.bf16.gmra.mxu1 %v466_v15 }
  0xe2   :  { %v421_v17 = vpop.f32.mrf.mxu0  ;;  %v429_v18 = vpop.f32.mrf.mxu1 }
  0xe3   :  { %v336_v19 = vadd.f32 %v421_v17, %v386_v16  ;;  %v344_v20 = vadd.f32 %v429_v18, %v386_v16 }
  0xe4   :  { %v213_v21 = vpop.f32.mrf.mxu0  ;;  %v245_v22 = vpop.f32.mrf.mxu1 }
  0xe5   :  { %352 = vst [vmem:[%s589_s3 + $0x10] sm:$0xff] %v336_v19  ;;  %360 = vst [vmem:[%s589_s3 + $0x50] sm:$0xff] %v344_v20  ;;  %v334_v23 = vadd.f32 %v386_v16, %v213_v21  ;;  %v342_v24 = vadd.f32 %v386_v16, %v245_v22 }
  0xe6   :  { %v422_v25 = vpop.f32.mrf.mxu0  ;;  %v430_v26 = vpop.f32.mrf.mxu1 }
  0xe7   :  { %350 = vst [vmem:[%s589_s3] sm:$0xff] %v334_v23  ;;  %358 = vst [vmem:[%s589_s3 + $0x40] sm:$0xff] %v342_v24  ;;  %v337_v27 = vadd.f32 %v422_v25, %v386_v16  ;;  %v345_v28 = vadd.f32 %v430_v26, %v386_v16 }
  0xe8   :  { %v216_v29 = vpop.f32.mrf.mxu0  ;;  %v248_v30 = vpop.f32.mrf.mxu1 }
  0xe9   :  { %353 = vst [vmem:[%s589_s3 + $0x18] sm:$0xff] %v337_v27  ;;  %361 = vst [vmem:[%s589_s3 + $0x58] sm:$0xff] %v345_v28  ;;  %v335_v31 = vadd.f32 %v386_v16, %v216_v29  ;;  %v343_v32 = vadd.f32 %v386_v16, %v248_v30 }
  0xea   :  { %v425_v33 = vpop.f32.mrf.mxu0  ;;  %v433_v34 = vpop.f32.mrf.mxu1 }
  0xeb   :  { %351 = vst [vmem:[%s589_s3 + $0x8] sm:$0xff] %v335_v31  ;;  %359 = vst [vmem:[%s589_s3 + $0x48] sm:$0xff] %v343_v32  ;;  %v340_v35 = vadd.f32 %v425_v33, %v386_v16  ;;  %v348_v36 = vadd.f32 %v433_v34, %v386_v16 }
  0xec   :  { %v229_v37 = vpop.f32.mrf.mxu0  ;;  %v261_v38 = vpop.f32.mrf.mxu1 }
  0xed   :  { %356 = vst [vmem:[%s589_s3 + $0x30] sm:$0xff] %v340_v35  ;;  %364 = vst [vmem:[%s589_s3 + $0x70] sm:$0xff] %v348_v36  ;;  %v338_v39 = vadd.f32 %v386_v16, %v229_v37  ;;  %v346_v40 = vadd.f32 %v386_v16, %v261_v38 }
  0xee   :  { %v426_v41 = vpop.f32.mrf.mxu0  ;;  %v434_v42 = vpop.f32.mrf.mxu1 }
  0xef   :  { %354 = vst [vmem:[%s589_s3 + $0x20] sm:$0xff] %v338_v39  ;;  %362 = vst [vmem:[%s589_s3 + $0x60] sm:$0xff] %v346_v40  ;;  %v341_v43 = vadd.f32 %v426_v41, %v386_v16  ;;  %v349_v44 = vadd.f32 %v434_v42, %v386_v16 }
  0xf0   :  { %v232_v45 = vpop.f32.mrf.mxu0  ;;  %v264_v46 = vpop.f32.mrf.mxu1 }
  0xf1   :  { %357 = vst [vmem:[%s589_s3 + $0x38] sm:$0xff] %v341_v43  ;;  %365 = vst [vmem:[%s589_s3 + $0x78] sm:$0xff] %v349_v44  ;;  %v339_v47 = vadd.f32 %v386_v16, %v232_v45  ;;  %v347_v48 = vadd.f32 %v386_v16, %v264_v46 }
  0xf3   :  { %355 = vst [vmem:[%s589_s3 + $0x28] sm:$0xff] %v339_v47  ;;  %363 = vst [vmem:[%s589_s3 + $0x68] sm:$0xff] %v347_v48 }

</bundles_post_ra>
